<compile_context>
chip_gen: v7x
topology: tpu7x:2x2x1
jax: 0.10.0
libtpu: 0.0.40
codegen_flags: <defaults>
</compile_context>

<pallas_src>
import math

import jax
import jax.numpy as jnp
from jax.experimental import pallas as pl
from jax.experimental.pallas import tpu as pltpu


def _round_up(v, m):
    return (v + m - 1) // m * m


# ----------------------------------------------------------------------------
# Pallas kernel: fused FX-MLP + fused (logits|value) head for one batch tile.
# ----------------------------------------------------------------------------
def actor_kernel(x_ref, w1_ref, b1_ref, w2_ref, b2_ref, wh_ref, bh_ref,
                 feat_ref, head_ref):
    x = x_ref[...]

    # Feature extractor: Linear -> ReLU -> Linear -> ReLU (f32 MXU accumulation)
    h1 = jnp.dot(x, w1_ref[...], preferred_element_type=jnp.float32) + b1_ref[...]
    h1 = jnp.maximum(h1, 0.0)
    feat = jnp.dot(h1, w2_ref[...], preferred_element_type=jnp.float32) + b2_ref[...]
    feat = jnp.maximum(feat, 0.0)
    feat_ref[...] = feat.astype(feat_ref.dtype)            # lane-dense [TB, H_pad]

    # Fused heads: [logits | state_value | zero-pad] in one matmul + one store
    head = jnp.dot(feat, wh_ref[...], preferred_element_type=jnp.float32) + bh_ref[...]
    head_ref[...] = head.astype(head_ref.dtype)            # lane-dense [TB, HEAD_pad]


# ----------------------------------------------------------------------------
# One-time parameter preparation (hoisted out of the per-call forward):
# transpose torch-convention [out, in] -> [in, out], fuse the two heads,
# and zero-pad output widths to multiples of 128 lanes.
# ----------------------------------------------------------------------------
def prepare_kernel_params(params):
    hidden = params["w2"].shape[0]
    n_act = params["wl"].shape[0]
    obs_dim = params["w1"].shape[1]
    h_pad = _round_up(hidden, 128)
    head_pad = _round_up(n_act + 1, 128)

    def pad2(a, rows, cols):
        return jnp.pad(a, ((0, rows - a.shape[0]), (0, cols - a.shape[1])))

    w1 = pad2(params["w1"].T, obs_dim, h_pad)                       # [obs, H_pad]
    b1 = jnp.pad(params["b1"], (0, h_pad - hidden)).reshape(1, h_pad)
    w2 = pad2(params["w2"].T, h_pad, h_pad)                         # [H_pad, H_pad]
    b2 = jnp.pad(params["b2"], (0, h_pad - hidden)).reshape(1, h_pad)
    wh = jnp.concatenate([params["wl"].T, params["wv"].T], axis=1)  # [hidden, n_act+1]
    wh = pad2(wh, h_pad, head_pad)                                  # [H_pad, HEAD_pad]
    bh = jnp.pad(jnp.concatenate([params["bl"], params["bv"]]),
                 (0, head_pad - (n_act + 1))).reshape(1, head_pad)

    return {"w1": w1, "b1": b1, "w2": w2, "b2": b2, "wh": wh, "bh": bh,
            "hidden": hidden, "n_act": n_act}


# ----------------------------------------------------------------------------
# Forward wrapper: pads the batch, tiles it across the grid, slices outputs.
# ----------------------------------------------------------------------------
def modular_actor_forward(x, kp):
    """x: [B, obs_dim] float32, kp: output of prepare_kernel_params."""
    B, obs_dim = x.shape
    hidden, n_act = kp["hidden"], kp["n_act"]
    h_pad = kp["w2"].shape[1]
    head_pad = kp["wh"].shape[1]

    # Batch tile: multiple of 8 sublanes, capped so double-buffered tiles stay
    # small; pad B so every tile is full (no ragged-tile masking required).
    tb = min(1024, _round_up(B, 8))
    b_pad = _round_up(B, tb)
    if b_pad != B:
        x = jnp.pad(x, ((0, b_pad - B), (0, 0)))

    def tile_spec(cols):
        return pl.BlockSpec((tb, cols), lambda i: (i, 0))

    def resident_spec(shape):
        return pl.BlockSpec(shape, lambda i: (0,) * len(shape))

    # VMEM budget: double-buffered x/feat/head tiles + resident weights + margin.
    tile_bytes = 4 * tb * (obs_dim + h_pad + head_pad)
    weight_bytes = 4 * sum(kp[k].size for k in ("w1", "b1", "w2", "b2", "wh", "bh"))
    vmem_limit = int(min(64 * 1024 * 1024,
                         max(4 * 1024 * 1024, 3 * tile_bytes + 2 * weight_bytes)))

    feat_p, head_p = pl.pallas_call(
        actor_kernel,
        grid=(b_pad // tb,),
        in_specs=[
            tile_spec(obs_dim),
            resident_spec(kp["w1"].shape), resident_spec(kp["b1"].shape),
            resident_spec(kp["w2"].shape), resident_spec(kp["b2"].shape),
            resident_spec(kp["wh"].shape), resident_spec(kp["bh"].shape),
        ],
        out_specs=[tile_spec(h_pad), tile_spec(head_pad)],
        out_shape=[
            jax.ShapeDtypeStruct((b_pad, h_pad), jnp.float32),
            jax.ShapeDtypeStruct((b_pad, head_pad), jnp.float32),
        ],
        compiler_params=pltpu.CompilerParams(
            dimension_semantics=("parallel",),
            vmem_limit_bytes=vmem_limit),
    )(x, kp["w1"], kp["b1"], kp["w2"], kp["b2"], kp["wh"], kp["bh"])

    # Mirrors ModularActor.forward's AttrDict output (slice off lane/batch pad).
    return {
        "features_0": feat_p[:B, :hidden],
        "logits": head_p[:B, :n_act],
        "state_values": head_p[:B, n_act:n_act + 1],
    }


# ----------------------------------------------------------------------------
# Deterministic "orthogonal_"-style weight init (mirrors the PyTorch helper).
# ----------------------------------------------------------------------------
def orthogonal_init(key, out_f, in_f, gain=math.sqrt(2)):
    a = jax.random.normal(key, (out_f, in_f), dtype=jnp.float32)
    q, r = jnp.linalg.qr(a.T if out_f < in_f else a)
    q = q * jnp.sign(jnp.diag(r))[None, :]
    w = q.T if out_f < in_f else q
    w = w[:out_f, :in_f]
    std = gain / math.sqrt(in_f)
    rms = jnp.sqrt(jnp.mean(w ** 2))
    return (w / rms * std).astype(jnp.float32)


def make_params(key, obs_dim, hidden, n_act):
    ks = jax.random.split(key, 4)
    return {
        "w1": orthogonal_init(ks[0], hidden, obs_dim),
        "b1": jnp.zeros((hidden,), jnp.float32),
        "w2": orthogonal_init(ks[1], hidden, hidden),
        "b2": jnp.zeros((hidden,), jnp.float32),
        "wl": orthogonal_init(ks[2], n_act, hidden, gain=0.01),
        "bl": jnp.zeros((n_act,), jnp.float32),
        "wv": orthogonal_init(ks[3], 1, hidden, gain=1.0),
        "bv": jnp.zeros((1,), jnp.float32),
    }


def reference_forward(x, p):
    h1 = jnp.maximum(x @ p["w1"].T + p["b1"], 0.0)
    feat = jnp.maximum(h1 @ p["w2"].T + p["b2"], 0.0)
    return {
        "features_0": feat,
        "logits": feat @ p["wl"].T + p["bl"],
        "state_values": feat @ p["wv"].T + p["bv"],
    }


if __name__ == "__main__":
    key = jax.random.PRNGKey(0)
    k_x, k_p = jax.random.split(key)

    batch, obs_dim, hidden, n_act = 8, 16, 32, 6
    x = jax.random.normal(k_x, (batch, obs_dim), dtype=jnp.float32)
    params = make_params(k_p, obs_dim, hidden, n_act)

    kparams = prepare_kernel_params(params)   # one-time (transpose / fuse / pad)
    out = modular_actor_forward(x, kparams)
    jax.block_until_ready(out)

    ref = reference_forward(x, params)
    for name in ("features_0", "logits", "state_values"):
        assert out[name].shape == ref[name].shape, name
        assert jnp.allclose(out[name], ref[name], atol=1e-4, rtol=1e-4), name

    # Also exercise a batch that is not a multiple of the tile size / 8.
    x2 = jax.random.normal(k_x, (batch + 3, obs_dim), dtype=jnp.float32)
    out2 = modular_actor_forward(x2, kparams)
    jax.block_until_ready(out2)
    ref2 = reference_forward(x2, params)
    for name in ("features_0", "logits", "state_values"):
        assert jnp.allclose(out2[name], ref2[name], atol=1e-4, rtol=1e-4), name

    # TODO(synk): recurrent FX path (memory chunk/cat) not instantiated — this
    # configuration uses is_recurrent=False, matching the default forward flow.
    # TODO(synk): optional bf16 activations for v6e (halves HBM traffic) kept
    # off to preserve exact f32 parity with the PyTorch reference.
    print("KERNEL_OK")
</pallas_src>

<mosaic_0001>
module attributes {stable_mosaic.version = 11 : i64} {
  func.func @actor_kernel(%arg0: i32, %arg1: memref<8x16xf32, #tpu.memory_space<vmem>>, %arg2: memref<16x128xf32, #tpu.memory_space<vmem>>, %arg3: memref<1x128xf32, #tpu.memory_space<vmem>>, %arg4: memref<128x128xf32, #tpu.memory_space<vmem>>, %arg5: memref<1x128xf32, #tpu.memory_space<vmem>>, %arg6: memref<128x128xf32, #tpu.memory_space<vmem>>, %arg7: memref<1x128xf32, #tpu.memory_space<vmem>>, %arg8: memref<8x128xf32, #tpu.memory_space<vmem>>, %arg9: memref<8x128xf32, #tpu.memory_space<vmem>>) attributes {dimension_semantics = [#tpu.dimension_semantics<parallel>], iteration_bounds = array<i64: 1>, scalar_prefetch = 0 : i64, scratch_operands = 0 : i64, tpu.core_type = #tpu.core_type<tc>, window_params = [{transform_indices = @transform_0, window_bounds = array<i64: 8, 16>}, {pipeline_mode = #tpu.pipeline_mode<synchronous>, transform_indices = @transform_1, window_bounds = array<i64: 16, 128>}, {pipeline_mode = #tpu.pipeline_mode<synchronous>, transform_indices = @transform_2, window_bounds = array<i64: 1, 128>}, {pipeline_mode = #tpu.pipeline_mode<synchronous>, transform_indices = @transform_3, window_bounds = array<i64: 128, 128>}, {pipeline_mode = #tpu.pipeline_mode<synchronous>, transform_indices = @transform_4, window_bounds = array<i64: 1, 128>}, {pipeline_mode = #tpu.pipeline_mode<synchronous>, transform_indices = @transform_5, window_bounds = array<i64: 128, 128>}, {pipeline_mode = #tpu.pipeline_mode<synchronous>, transform_indices = @transform_6, window_bounds = array<i64: 1, 128>}, {transform_indices = @transform_7, window_bounds = array<i64: 8, 128>}, {transform_indices = @transform_8, window_bounds = array<i64: 8, 128>}]} {
    %c0 = arith.constant 0 : index
    %c0_0 = arith.constant 0 : index
    %0 = vector.load %arg1[%c0, %c0_0] : memref<8x16xf32, #tpu.memory_space<vmem>>, vector<8x16xf32>
    %c0_1 = arith.constant 0 : index
    %c0_2 = arith.constant 0 : index
    %1 = vector.load %arg2[%c0_1, %c0_2] : memref<16x128xf32, #tpu.memory_space<vmem>>, vector<16x128xf32>
    %cst = arith.constant dense<0.000000e+00> : vector<8x128xf32>
    %2 = tpu.matmul %0, %1, %cst {dimension_numbers = #tpu.dot_dimension_numbers<[1], [0], [0], [1], [0, 0, 1, 1], [], []>} : vector<8x16xf32>, vector<16x128xf32>, vector<8x128xf32> -> vector<8x128xf32>
    %c0_3 = arith.constant 0 : index
    %c0_4 = arith.constant 0 : index
    %3 = vector.load %arg3[%c0_3, %c0_4] : memref<1x128xf32, #tpu.memory_space<vmem>>, vector<1x128xf32>
    %4 = vector.broadcast %3 : vector<1x128xf32> to vector<8x128xf32>
    %5 = arith.addf %2, %4 : vector<8x128xf32>
    %cst_5 = arith.constant 0.000000e+00 : f32
    %6 = vector.broadcast %cst_5 : f32 to vector<8x128xf32>
    %7 = arith.maximumf %5, %6 : vector<8x128xf32>
    %c0_6 = arith.constant 0 : index
    %c0_7 = arith.constant 0 : index
    %8 = vector.load %arg4[%c0_6, %c0_7] : memref<128x128xf32, #tpu.memory_space<vmem>>, vector<128x128xf32>
    %cst_8 = arith.constant dense<0.000000e+00> : vector<8x128xf32>
    %9 = tpu.matmul %7, %8, %cst_8 {dimension_numbers = #tpu.dot_dimension_numbers<[1], [0], [0], [1], [0, 0, 1, 1], [], []>} : vector<8x128xf32>, vector<128x128xf32>, vector<8x128xf32> -> vector<8x128xf32>
    %c0_9 = arith.constant 0 : index
    %c0_10 = arith.constant 0 : index
    %10 = vector.load %arg5[%c0_9, %c0_10] : memref<1x128xf32, #tpu.memory_space<vmem>>, vector<1x128xf32>
    %11 = vector.broadcast %10 : vector<1x128xf32> to vector<8x128xf32>
    %12 = arith.addf %9, %11 : vector<8x128xf32>
    %cst_11 = arith.constant 0.000000e+00 : f32
    %13 = vector.broadcast %cst_11 : f32 to vector<8x128xf32>
    %14 = arith.maximumf %12, %13 : vector<8x128xf32>
    %c0_12 = arith.constant 0 : index
    %c0_13 = arith.constant 0 : index
    %15 = vector.load %arg8[%c0_12, %c0_13] : memref<8x128xf32, #tpu.memory_space<vmem>>, vector<8x128xf32>
    tpu.vector_store %arg8[%c0_12, %c0_13], %14 {strides = array<i32>} : memref<8x128xf32, #tpu.memory_space<vmem>>, vector<8x128xf32>,
    %c0_14 = arith.constant 0 : index
    %c0_15 = arith.constant 0 : index
    %16 = vector.load %arg6[%c0_14, %c0_15] : memref<128x128xf32, #tpu.memory_space<vmem>>, vector<128x128xf32>
    %cst_16 = arith.constant dense<0.000000e+00> : vector<8x128xf32>
    %17 = tpu.matmul %14, %16, %cst_16 {dimension_numbers = #tpu.dot_dimension_numbers<[1], [0], [0], [1], [0, 0, 1, 1], [], []>} : vector<8x128xf32>, vector<128x128xf32>, vector<8x128xf32> -> vector<8x128xf32>
    %c0_17 = arith.constant 0 : index
    %c0_18 = arith.constant 0 : index
    %18 = vector.load %arg7[%c0_17, %c0_18] : memref<1x128xf32, #tpu.memory_space<vmem>>, vector<1x128xf32>
    %19 = vector.broadcast %18 : vector<1x128xf32> to vector<8x128xf32>
    %20 = arith.addf %17, %19 : vector<8x128xf32>
    %c0_19 = arith.constant 0 : index
    %c0_20 = arith.constant 0 : index
    %21 = vector.load %arg9[%c0_19, %c0_20] : memref<8x128xf32, #tpu.memory_space<vmem>>, vector<8x128xf32>
    tpu.vector_store %arg9[%c0_19, %c0_20], %20 {strides = array<i32>} : memref<8x128xf32, #tpu.memory_space<vmem>>, vector<8x128xf32>,
    return
  }
  func.func @transform_0(%arg0: i32) -> (i32, i32) {
    %c0_i32 = arith.constant 0 : i32
    %c0_i32_0 = arith.constant 0 : i32
    return %arg0, %c0_i32 : i32, i32
  }
  func.func @transform_1(%arg0: i32) -> (i32, i32) {
    %c0_i32 = arith.constant 0 : i32
    %c0_i32_0 = arith.constant 0 : i32
    %c0_i32_1 = arith.constant 0 : i32
    return %c0_i32, %c0_i32_0 : i32, i32
  }
  func.func @transform_2(%arg0: i32) -> (i32, i32) {
    %c0_i32 = arith.constant 0 : i32
    %c0_i32_0 = arith.constant 0 : i32
    %c0_i32_1 = arith.constant 0 : i32
    return %c0_i32, %c0_i32_0 : i32, i32
  }
  func.func @transform_3(%arg0: i32) -> (i32, i32) {
    %c0_i32 = arith.constant 0 : i32
    %c0_i32_0 = arith.constant 0 : i32
    %c0_i32_1 = arith.constant 0 : i32
    return %c0_i32, %c0_i32_0 : i32, i32
  }
  func.func @transform_4(%arg0: i32) -> (i32, i32) {
    %c0_i32 = arith.constant 0 : i32
    %c0_i32_0 = arith.constant 0 : i32
    %c0_i32_1 = arith.constant 0 : i32
    return %c0_i32, %c0_i32_0 : i32, i32
  }
  func.func @transform_5(%arg0: i32) -> (i32, i32) {
    %c0_i32 = arith.constant 0 : i32
    %c0_i32_0 = arith.constant 0 : i32
    %c0_i32_1 = arith.constant 0 : i32
    return %c0_i32, %c0_i32_0 : i32, i32
  }
  func.func @transform_6(%arg0: i32) -> (i32, i32) {
    %c0_i32 = arith.constant 0 : i32
    %c0_i32_0 = arith.constant 0 : i32
    %c0_i32_1 = arith.constant 0 : i32
    return %c0_i32, %c0_i32_0 : i32, i32
  }
  func.func @transform_7(%arg0: i32) -> (i32, i32) {
    %c0_i32 = arith.constant 0 : i32
    %c0_i32_0 = arith.constant 0 : i32
    return %arg0, %c0_i32 : i32, i32
  }
  func.func @transform_8(%arg0: i32) -> (i32, i32) {
    %c0_i32 = arith.constant 0 : i32
    %c0_i32_0 = arith.constant 0 : i32
    return %arg0, %c0_i32 : i32, i32
  }
}

</mosaic_0001>

<bundles_post_ra>
// kernel: tpu_custom_call.1
= control target key start
LH: loop header
LB: loop body
LE: loop exit
PB: predicated region body
PF: predicated region fallthrough
CT: control target
= control target key end

     0   :  { %14 = vsyncpa [#allocation3], 0  ;;  %s876_s0 = inlined_call_operand.hbm [shape: f32[8,16], index: 0, kind: input, shape index: {}]   ;;  %s877_s1 = inlined_call_operand.hbm [shape: f32[16,128], index: 1, kind: input, shape index: {}]   ;;  %s878_s2 = inlined_call_operand.vmem [shape: f32[1,128], index: 2, kind: input, shape index: {}]   ;;  %s879_s3 = inlined_call_operand.hbm [shape: f32[128,128], index: 3, kind: input, shape index: {}]   ;;  %s880_s4 = inlined_call_operand.vmem [shape: f32[1,128], index: 4, kind: input, shape index: {}]   ;;  %s881_s5 = inlined_call_operand.hbm [shape: f32[128,128], index: 5, kind: input, shape index: {}]   ;;  %s882_s6 = inlined_call_operand.vmem [shape: f32[1,128], index: 6, kind: input, shape index: {}]   ;;  %s883_s7 = inlined_call_operand.hbm [shape: f32[8,128], index: 7, kind: output, shape index: {0}]   ;;  %s884_s8 = inlined_call_operand.hbm [shape: f32[8,128], index: 8, kind: output, shape index: {1}]  }
   0x1   :  { %15 = vsyncpa [#allocation6], 0 }
   0x2   :  { %16 = vsyncpa [#allocation9], 0 }
   0x3   :  { %17 = vsyncpa [#allocation4], 0 }
   0x4   :  { %18 = vsyncpa [#allocation12], 0  ;;  %s710_s27 = smov [#allocation5]   ;;  %s568_s9 = scalar_lea.hbm %s877_s1, 256 }
   0x5   :  { %s34_s28 = sshll.u32 %s710_s27, 4  ;;  %p569_p0 = scmp.ne.s32.totalorder %s877_s1, %s568_s9  ;;  %s35_s28 = int_to_ptr.vmem [resolvable:$true] %s34_s28 }
   0x6   :  { %p572_p1 = scmp.lt.u32.totalorder %s568_s9, %s877_s1 }
   0x8   :  { %p574_p2 = pnand %p572_p1, %p569_p0 }
   0xa   :  { %577 = shalt.err (!%p574_p2)
}
   0xb   :  { %s578_s14 = scalar_lea.vmem %s35_s28, 256  ;;  %p583_p4 = scmp.lt.s32.totalorder %s35_s28, %s35_s28 }
   0xc   :  { %p579_p3 = scmp.ne.s32.totalorder %s35_s28, %s578_s14  ;;  %p584_p5 = scmp.lt.s32.totalorder %s578_s14, %s578_s14 }
   0xe   :  { %p585_p6 = por %p584_p5, %p583_p4 }
  0x10   :  { %p586_p7 = pnand %p585_p6, %p579_p3 }
  0x12   :  { %589 = shalt.err (!%p586_p7)
}
  0x13   :  { %s711_s15 = smov 128   ;;  %s712_s16 = smov 8  }
  0x14   :  { %40 = dma.hbm_to_vmem [thread:$0]  %s877_s1, 256, %s35_s28, [#allocation6], %s711_s15, %s711_s15, %s712_s16  }
  0x15   :  { %s713_s19 = smov [#allocation2]   ;;  %s714_s21 = smov [#allocation7]  }
  0x16   :  { %s25_s20 = sshll.u32 %s713_s19, 4  ;;  %s48_s22 = sshll.u32 %s714_s21, 4  ;;  %s26_s20 = int_to_ptr.vmem [resolvable:$true] %s25_s20  ;;  %s49_s22 = int_to_ptr.vmem [resolvable:$true] %s48_s22 }
  0x17   :  { %s590_s25 = scalar_lea.hbm %s876_s0, 128 }
  0x18   :  { %p591_p8 = scmp.ne.s32.totalorder %s876_s0, %s590_s25  ;;  %p594_p9 = scmp.lt.u32.totalorder %s590_s25, %s876_s0 }
  0x1a   :  { %p596_p10 = pnand %p594_p9, %p591_p8 }
  0x1c   :  { %599 = shalt.err (!%p596_p10)
}
  0x1d   :  { %s600_s1 = scalar_lea.vmem %s26_s20, 128  ;;  %p605_p12 = scmp.lt.s32.totalorder %s26_s20, %s26_s20 }
  0x1e   :  { %p601_p11 = scmp.ne.s32.totalorder %s26_s20, %s600_s1  ;;  %p606_p13 = scmp.lt.s32.totalorder %s600_s1, %s600_s1 }
  0x20   :  { %p607_p0 = por %p606_p13, %p605_p12 }
  0x22   :  { %p608_p1 = pnand %p607_p0, %p601_p11 }
  0x24   :  { %611 = shalt.err (!%p608_p1)
}
  0x25   :  { %28 = dma.hbm_to_vmem [thread:$0]  %s876_s0, 128, %s26_s20, [#allocation3]  }
  0x26   :  { %s612_s12 = scalar_lea.hbm %s879_s3, 2048 }
  0x27   :  { %p613_p2 = scmp.ne.s32.totalorder %s879_s3, %s612_s12  ;;  %p616_p3 = scmp.lt.u32.totalorder %s612_s12, %s879_s3 }
  0x29   :  { %p618_p4 = pnand %p616_p3, %p613_p2 }
  0x2b   :  { %621 = shalt.err (!%p618_p4)
}
  0x2c   :  { %s622_s19 = scalar_lea.vmem %s49_s22, 2048  ;;  %p627_p6 = scmp.lt.s32.totalorder %s49_s22, %s49_s22 }
  0x2d   :  { %p623_p5 = scmp.ne.s32.totalorder %s49_s22, %s622_s19  ;;  %p628_p7 = scmp.lt.s32.totalorder %s622_s19, %s622_s19 }
  0x2f   :  { %p629_p8 = por %p628_p7, %p627_p6 }
  0x31   :  { %p630_p9 = pnand %p629_p8, %p623_p5 }
  0x33   :  { %633 = shalt.err (!%p630_p9)
}
  0x34   :  { %54 = dma.hbm_to_vmem [thread:$0]  %s879_s3, 2048, %s49_s22, [#allocation6], %s711_s15, %s711_s15, %s712_s16  }
  0x35   :  { %s715_s21 = smov [#allocation8]   ;;  %s634_s26 = scalar_lea.hbm %s881_s5, 2048 }
  0x36   :  { %s62_s23 = sshll.u32 %s715_s21, 4  ;;  %p635_p10 = scmp.ne.s32.totalorder %s881_s5, %s634_s26  ;;  %s63_s23 = int_to_ptr.vmem [resolvable:$true] %s62_s23 }
  0x37   :  { %p638_p11 = scmp.lt.u32.totalorder %s634_s26, %s881_s5 }
  0x39   :  { %p640_p12 = pnand %p638_p11, %p635_p10 }
  0x3b   :  { %643 = shalt.err (!%p640_p12)
}
  0x3c   :  { %s644_s28 = scalar_lea.vmem %s63_s23, 2048  ;;  %p649_p0 = scmp.lt.s32.totalorder %s63_s23, %s63_s23 }
  0x3d   :  { %p645_p13 = scmp.ne.s32.totalorder %s63_s23, %s644_s28  ;;  %p650_p1 = scmp.lt.s32.totalorder %s644_s28, %s644_s28 }
  0x3f   :  { %p651_p2 = por %p650_p1, %p649_p0 }
  0x41   :  { %p652_p3 = pnand %p651_p2, %p645_p13 }
  0x43   :  { %655 = shalt.err (!%p652_p3)
}
  0x44   :  { %68 = dma.hbm_to_vmem [thread:$0]  %s881_s5, 2048, %s63_s23, [#allocation9], %s711_s15, %s711_s15, %s712_s16  }
  0x45   :  { %700 = dma.done.wait [#allocation3], 128  }
  0x46   :  { %701 = vsyncadd [#allocation3], 4294967168 }
  0x47   :  { %702 = dma.done.wait [#allocation6], 2304  }
  0x48   :  { %703 = vsyncadd [#allocation6], 4294964992 }
  0x49   :  { %704 = dma.done.wait [#allocation9], 2048  }
  0x4a   :  { %705 = vsyncadd [#allocation9], 4294965248  ;;  %v716_v0 = vmov 0.0|0.0   ;;  %vm717_vm0 = vmmov 0   ;;  %v718_v1 = vmov 0.0   ;;  %v84_v2 = vld [vmem:[#allocation5] sm:$0xff] }
  0x4b   :  { %506 = vmatprep.subr.bf16.mxu0 %v716_v0  ;;  %433 = vmatprep.mubr.msk.f32.mxu0 %vm717_vm0, %v718_v1  ;;  %v85_v3 = vld [vmem:[#allocation5 + $0x8] sm:$0xff]  ;;  %v168_v5 = vld [vmem:[#allocation7] sm:$0xff]  ;;  %v169_v6 = vld [vmem:[#allocation7 + $0x8] sm:$0xff]  ;;  %vm93_vm1 = vcmask 130048  }
  0x4c   :  { %509 = vmatprep.subr.bf16.mxu1 %v716_v0  ;;  %468 = vmatprep.mubr.msk.f32.mxu1 %vm717_vm0, %v718_v1  ;;  %v507_v4 = vpack.c.bf16 %v85_v3, %v84_v2  ;;  %v170_v7 = vld [vmem:[#allocation7 + $0x10] sm:$0xff]  ;;  %v510_v8 = vpack.c.bf16 %v169_v6, %v168_v5  ;;  %v171_v9 = vld [vmem:[#allocation7 + $0x18] sm:$0xff]  ;;  %v83_v10 = vld [vmem:[#allocation2] sm:$0xff] }
  0x4d   :  { %v513_v11 = vpack.c.bf16 %v171_v9, %v170_v7  ;;  %v172_v12 = vld [vmem:[#allocation7 + $0x20] sm:$0xff]  ;;  %v173_v13 = vld [vmem:[#allocation7 + $0x28] sm:$0xff]  ;;  %v174_v15 = vld [vmem:[#allocation7 + $0x30] sm:$0xff] }
  0x4e   :  { %508 = vmatpush3.bf16.msra.mxu0 %v507_v4  ;;  %511 = vmatpush3.bf16.msra.mxu1 %v510_v8  ;;  %v516_v14 = vpack.c.bf16 %v173_v13, %v172_v12  ;;  %v175_v16 = vld [vmem:[#allocation7 + $0x38] sm:$0xff]  ;;  %v176_v18 = vld [vmem:[#allocation7 + $0x40] sm:$0xff]  ;;  %v177_v19 = vld [vmem:[#allocation7 + $0x48] sm:$0xff] }
  0x4f   :  { %533 = vmatprep.subr.bf16.mxu0 %v716_v0  ;;  %512 = vmatprep.subr.bf16.mxu1 %v716_v0  ;;  %v519_v17 = vpack.c.bf16 %v175_v16, %v174_v15  ;;  %v522_v20 = vpack.c.bf16 %v177_v19, %v176_v18  ;;  %v178_v21 = vld [vmem:[#allocation7 + $0x50] sm:$0xff]  ;;  %v179_v22 = vld [vmem:[#allocation7 + $0x58] sm:$0xff]  ;;  %v180_v24 = vld [vmem:[#allocation7 + $0x60] sm:$0xff] }
  0x50   :  { %v525_v23 = vpack.c.bf16 %v179_v22, %v178_v21  ;;  %v181_v25 = vld [vmem:[#allocation7 + $0x68] sm:$0xff]  ;;  %v182_v27 = vld [vmem:[#allocation7 + $0x70] sm:$0xff]  ;;  %v183_v28 = vld [vmem:[#allocation7 + $0x78] sm:$0xff] }
  0x51   :  { %434 = vmatmul.mubr.msk.f32.vlgmr.msra.gmra.mrb[0].mxu0 %vm93_vm1, %v83_v10  ;;  %v528_v26 = vpack.c.bf16 %v181_v25, %v180_v24  ;;  %v531_v29 = vpack.c.bf16 %v183_v28, %v182_v27  ;;  %v263_v30 = vld [vmem:[#allocation8] sm:$0xff]  ;;  %v264_v31 = vld [vmem:[#allocation8 + $0x8] sm:$0xff]  ;;  %v265_v32 = vld [vmem:[#allocation8 + $0x10] sm:$0xff] }
  0x52   :  { %503 = vmatprep.mubr.msk.f32.mxu0 %vm717_vm0, %v718_v1  ;;  %514 = vmatpush3.bf16.msra.mxu1 %v513_v11  ;;  %v534_v33 = vpack.c.bf16 %v264_v31, %v263_v30  ;;  %v266_v34 = vld [vmem:[#allocation8 + $0x18] sm:$0xff]  ;;  %v267_v36 = vld [vmem:[#allocation8 + $0x20] sm:$0xff]  ;;  %v268_v37 = vld [vmem:[#allocation8 + $0x28] sm:$0xff] }
  0x53   :  { %515 = vmatprep.subr.bf16.mxu1 %v716_v0  ;;  %v537_v35 = vpack.c.bf16 %v266_v34, %v265_v32  ;;  %v540_v38 = vpack.c.bf16 %v268_v37, %v267_v36  ;;  %v269_v39 = vld [vmem:[#allocation8 + $0x30] sm:$0xff]  ;;  %v270_v40 = vld [vmem:[#allocation8 + $0x38] sm:$0xff]  ;;  %v271_v42 = vld [vmem:[#allocation8 + $0x40] sm:$0xff] }
  0x54   :  { %535 = vmatpush3.bf16.msra.mxu0 %v534_v33  ;;  %v543_v41 = vpack.c.bf16 %v270_v40, %v269_v39  ;;  %v272_v43 = vld [vmem:[#allocation8 + $0x48] sm:$0xff]  ;;  %v273_v45 = vld [vmem:[#allocation8 + $0x50] sm:$0xff]  ;;  %v274_v46 = vld [vmem:[#allocation8 + $0x58] sm:$0xff] }
  0x55   :  { %536 = vmatprep.subr.bf16.mxu0 %v716_v0  ;;  %v546_v44 = vpack.c.bf16 %v272_v43, %v271_v42  ;;  %v549_v47 = vpack.c.bf16 %v274_v46, %v273_v45  ;;  %v275_v48 = vld [vmem:[#allocation8 + $0x60] sm:$0xff]  ;;  %v276_v49 = vld [vmem:[#allocation8 + $0x68] sm:$0xff]  ;;  %v277_v56 = vld [vmem:[#allocation8 + $0x70] sm:$0xff] }
  0x56   :  { %517 = vmatpush3.bf16.msra.mxu1 %v516_v14  ;;  %v552_v50 = vpack.c.bf16 %v276_v49, %v275_v48  ;;  %v388_v51 = vld [vmem:[%s878_s2] ss:$0 sm:$0xff]  ;;  %v278_v57 = vld [vmem:[#allocation8 + $0x78] sm:$0xff]  ;;  %s719_s2 = smov [#allocation10]  }
  0x57   :  { %518 = vmatprep.subr.bf16.mxu1 %v716_v0  ;;  %v555_v58 = vpack.c.bf16 %v278_v57, %v277_v56  ;;  %v390_v59 = vld [vmem:[%s880_s4] ss:$0 sm:$0xff]  ;;  %s363_s10 = sshll.u32 %s719_s2, 4  ;;  %s364_s10 = int_to_ptr.vmem [resolvable:$true] %s363_s10 }
  0x58   :  { %538 = vmatpush3.bf16.msra.mxu0 %v537_v35  ;;  %s656_s11 = scalar_lea.vmem %s364_s10, 128  ;;  %p661_p5 = scmp.lt.s32.totalorder %s364_s10, %s364_s10 }
  0x59   :  { %539 = vmatprep.subr.bf16.mxu0 %v716_v0  ;;  %p657_p4 = scmp.ne.s32.totalorder %s364_s10, %s656_s11  ;;  %p662_p6 = scmp.lt.s32.totalorder %s656_s11, %s656_s11 }
  0x5a   :  { %520 = vmatpush3.bf16.msra.mxu1 %v519_v17 }
  0x5b   :  { %521 = vmatprep.subr.bf16.mxu1 %v716_v0  ;;  %p663_p7 = por %p662_p6, %p661_p5 }
  0x5c   :  { %541 = vmatpush3.bf16.msra.mxu0 %v540_v38 }
  0x5d   :  { %542 = vmatprep.subr.bf16.mxu0 %v716_v0  ;;  %p664_p8 = pnand %p663_p7, %p657_p4 }
  0x5e   :  { %523 = vmatpush3.bf16.msra.mxu1 %v522_v20 }
  0x5f   :  { %524 = vmatprep.subr.bf16.mxu1 %v716_v0 }
  0x60   :  { %544 = vmatpush3.bf16.msra.mxu0 %v543_v41 }
  0x61   :  { %545 = vmatprep.subr.bf16.mxu0 %v716_v0 }
  0x62   :  { %526 = vmatpush3.bf16.msra.mxu1 %v525_v23 }
  0x63   :  { %527 = vmatprep.subr.bf16.mxu1 %v716_v0 }
  0x64   :  { %547 = vmatpush3.bf16.msra.mxu0 %v546_v44 }
  0x65   :  { %548 = vmatprep.subr.bf16.mxu0 %v716_v0 }
  0x66   :  { %529 = vmatpush3.bf16.msra.mxu1 %v528_v26 }
  0x67   :  { %530 = vmatprep.subr.bf16.mxu1 %v716_v0 }
  0x68   :  { %550 = vmatpush3.bf16.msra.mxu0 %v549_v47 }
  0x69   :  { %551 = vmatprep.subr.bf16.mxu0 %v716_v0 }
  0x6a   :  { %532 = vmatpush3.bf16.msra.mxu1 %v531_v29 }
  0x6c   :  { %553 = vmatpush3.bf16.msra.mxu0 %v552_v50 }
  0x6d   :  { %554 = vmatprep.subr.bf16.mxu0 %v716_v0 }
  0x70   :  { %556 = vmatpush3.bf16.msra.mxu0 %v555_v58 }
 0x124   :  { %v163_v52 = vpop.f32.mrb[0].mxu0 }
 0x125   :  { %v164_v53 = vadd.f32 %v388_v51, %v163_v52  ;;  %v435_v54 = vpop.f32.mrb[1].mxu0 }
 0x127   :  { %v167_v55 = vmax.f32 %v164_v53, 0.0 }
 0x129   :  { %469 = vmatmul.mubr.f32.vlgmr.msra.gmra.mrb[0].mxu1 %v167_v55 }
 0x1fc   :  { %v257_v60 = vpop.f32.mrb[0].mxu1 }
 0x1fd   :  { %v258_v61 = vadd.f32 %v390_v59, %v257_v60  ;;  %v470_v62 = vpop.f32.mrb[1].mxu1 }
 0x1ff   :  { %v261_v63 = vmax.f32 %v258_v61, 0.0 }
 0x201   :  { %262 = vst [vmem:[#allocation10] sm:$0xff] %v261_v63  ;;  %504 = vmatmul.mubr.f32.vlgmr.msra.gmra.mrb[2].mxu0 %v261_v63 }
 0x202   :  { %667 = shalt.err (!%p664_p8)
}
 0x203   :  { %s668_s4 = scalar_lea.hbm %s883_s7, 128 }
 0x204   :  { %p669_p9 = scmp.ne.s32.totalorder %s883_s7, %s668_s4  ;;  %p672_p10 = scmp.lt.u32.totalorder %s668_s4, %s883_s7 }
 0x206   :  { %p674_p11 = pnand %p672_p10, %p669_p9 }
 0x208   :  { %677 = shalt.err (!%p674_p11)
}
 0x209   :  { %366 = dma.vmem_to_hbm [thread:$0]  %s364_s10, 128, %s883_s7, [#allocation4]   ;;  %v391_v0 = vld [vmem:[%s882_s6] ss:$0 sm:$0xff] }
 0x20a   :  { %s720_s24 = smov [#allocation11]  }
 0x20b   :  { %s373_s25 = sshll.u32 %s720_s24, 4  ;;  %s374_s25 = int_to_ptr.vmem [resolvable:$true] %s373_s25 }
 0x20c   :  { %s678_s26 = scalar_lea.vmem %s374_s25, 128  ;;  %p683_p13 = scmp.lt.s32.totalorder %s374_s25, %s374_s25 }
 0x20d   :  { %p679_p12 = scmp.ne.s32.totalorder %s374_s25, %s678_s26  ;;  %p684_p0 = scmp.lt.s32.totalorder %s678_s26, %s678_s26 }
 0x20f   :  { %p685_p1 = por %p684_p0, %p683_p13 }
 0x211   :  { %p686_p2 = pnand %p685_p1, %p679_p12 }
 0x2d4   :  { %v352_v1 = vpop.f32.mrb[2].mxu0 }
 0x2d5   :  { %v353_v2 = vadd.f32 %v391_v0, %v352_v1  ;;  %v505_v3 = vpop.f32.mrb[3].mxu0 }
 0x2d7   :  { %356 = vst [vmem:[#allocation11] sm:$0xff] %v353_v2 }
 0x2d8   :  { %689 = shalt.err (!%p686_p2)
}
 0x2d9   :  { %s690_s29 = scalar_lea.hbm %s884_s8, 128 }
 0x2da   :  { %p691_p3 = scmp.ne.s32.totalorder %s884_s8, %s690_s29  ;;  %p694_p4 = scmp.lt.u32.totalorder %s690_s29, %s884_s8 }
 0x2dc   :  { %p696_p5 = pnand %p694_p4, %p691_p3 }
 0x2de   :  { %699 = shalt.err (!%p696_p5)
}
 0x2df   :  { %376 = dma.vmem_to_hbm [thread:$0]  %s374_s25, 128, %s884_s8, [#allocation12]  }
 0x2e0   :  { %706 = dma.done.wait [#allocation4], 128  }
 0x2e1   :  { %707 = vsyncadd [#allocation4], 4294967168 }
 0x2e2   :  { %708 = dma.done.wait [#allocation12], 128  }
 0x2e3   :  { %709 = vsyncadd [#allocation12], 4294967168 }
 0x2e4   :  { %383 = vsyncpa [#allocation3], 1 }
 0x2e5   :  { %384 = vsyncpa [#allocation6], 1 }
 0x2e6   :  { %385 = vsyncpa [#allocation9], 1 }
 0x2e7   :  { %386 = vsyncpa [#allocation4], 1 }
 0x2e8   :  { %387 = vsyncpa [#allocation12], 1 }

</bundles_post_ra>
